<compile_context>
chip_gen: v6e
topology: v6e:2x2x1
jax: 0.10.0
libtpu: 0.0.40
codegen_flags: <defaults>
</compile_context>

<pallas_src>
import jax
import jax.numpy as jnp
from jax import lax
from jax.experimental import pallas as pl
from jax.experimental.pallas import tpu as pltpu


_TARGET_F32_BLOCK_BYTES = 4 << 20        # ~4 MiB of f32 working set per grid step
_ACC_ROWS = 8                            # one sublane tile for the accumulator
_VMEM_LIMIT_BYTES = 40 * 1024 * 1024     # fits v7x (64 MiB physical) with headroom


def _num_tensorcores() -> int:
    """Best-effort TensorCores per device: 2 on v7x, 1 on v5e/v6e (safe default 1)."""
    try:
        kind = jax.devices()[0].device_kind.lower()
    except Exception:
        return 1
    return 2 if "v7" in kind else 1


def _make_kernel(*, block_rows, lanes, acc_rows, steps, valid_rows, needs_mask):
    groups = block_rows // acc_rows

    def kernel(o_ref, t_ref, out_ref, acc_ref):
        p = pl.program_id(0)
        i = pl.program_id(1)

        # Init the (small) accumulator at the start of each core's reduction range.
        @pl.when(i == 0)
        def _():
            acc_ref[...] = jnp.zeros_like(acc_ref)

        # Hot path: elementwise diff/square folded into the small accumulator with
        # pure VPU adds.  All of this hides under the HBM DMA of the next block.
        d = o_ref[...].astype(jnp.float32) - t_ref[...].astype(jnp.float32)

        if needs_mask:
            # Zero out rows past the end of the real data (ragged last block and, on
            # 2-core chips, any clamped phantom block).  Garbage rows become exactly 0.
            row0 = (p * steps + i) * block_rows
            rid = row0 + lax.broadcasted_iota(jnp.int32, (block_rows, 1), 0)
            d = jnp.where(rid < valid_rows, d, 0.0)

        sq = d * d
        if groups > 1:
            # (block_rows, lanes) -> (groups, acc_rows, lanes); leading-axis sum is
            # vreg-wise VPU adds (no XLU), keeping the accumulator one sublane tile.
            sq = jnp.sum(sq.reshape(groups, acc_rows, lanes), axis=0)
        acc_ref[...] += sq

        # Finalize: collapse to one partial sum per parallel slot.  Sublane direction
        # first (cheap), then a single cross-lane reduction on one row.
        @pl.when(i == pl.num_programs(1) - 1)
        def _():
            s = jnp.sum(acc_ref[...], axis=0, keepdims=True)   # (1, lanes)
            s = jnp.sum(s, axis=1, keepdims=True)              # (1, 1)
            out_ref[...] = s.reshape(1, 1, 1)

    return kernel


def center_loss(outputs, targets, *, block_rows=None):
    """Pallas equivalent of CenterLoss().forward(outputs, targets)."""
    assert outputs.shape == targets.shape, "outputs/targets must have matching shapes"
    n = outputs.shape[0]
    total = outputs.size

    # Pick a lane width (multiple of 128) that divides the element count so the
    # flatten + reshape is a free bitcast: no host-side pad/copy of the inputs.
    lanes = next((c for c in (512, 256, 128) if total % c == 0), None)

    o_flat = outputs.reshape(-1)
    t_flat = targets.reshape(-1)
    if lanes is None:
        # Rare ragged path (element count not a multiple of 128): pad by < 128
        # elements.  This does materialize one copy of each input; acceptable only
        # because this case is uncommon for real tensors.
        lanes = 128
        padded_total = pl.cdiv(total, lanes) * lanes
        o_flat = jnp.pad(o_flat, (0, padded_total - total))
        t_flat = jnp.pad(t_flat, (0, padded_total - total))
        work_total = padded_total
    else:
        work_total = total

    rows = work_total // lanes
    o2 = o_flat.reshape(rows, lanes)
    t2 = t_flat.reshape(rows, lanes)

    # Block rows: ~4 MiB of f32 working set (multiple of 8 sublanes), or the whole
    # array when it is smaller than one block.
    if block_rows is None:
        target_rows = max(8, (_TARGET_F32_BLOCK_BYTES // (lanes * 4)) // 8 * 8)
    else:
        assert block_rows % 8 == 0, "block_rows override must be a multiple of 8"
        target_rows = block_rows
    blk_rows = rows if rows <= target_rows else target_rows
    n_blocks = pl.cdiv(rows, blk_rows)

    # Split blocks across TensorCores only on 2-core chips (v7x); 1 elsewhere.
    n_par = max(1, min(_num_tensorcores(), n_blocks))
    steps = pl.cdiv(n_blocks, n_par)

    # Masking is needed iff the last block is ragged or a phantom block exists.
    needs_mask = (rows % blk_rows != 0) or (n_par * steps != n_blocks)

    acc_rows = _ACC_ROWS if (blk_rows % _ACC_ROWS == 0 and blk_rows > _ACC_ROWS) else blk_rows

    kernel = _make_kernel(block_rows=blk_rows, lanes=lanes, acc_rows=acc_rows,
                          steps=steps, valid_rows=rows, needs_mask=needs_mask)

    if n_par * steps == n_blocks:
        in_index = lambda p, i: (p * steps + i, 0)
    else:
        # Clamp phantom block indices into range (their contribution is masked to 0)
        # so no DMA is ever issued past the end of the arrays.
        last_block = n_blocks - 1
        in_index = lambda p, i: (jnp.minimum(p * steps + i, last_block), 0)

    in_spec = pl.BlockSpec((blk_rows, lanes), in_index)

    partial = pl.pallas_call(
        kernel,
        out_shape=jax.ShapeDtypeStruct((n_par, 1, 1), jnp.float32),
        grid_spec=pltpu.PrefetchScalarGridSpec(
            num_scalar_prefetch=0,
            grid=(n_par, steps),
            in_specs=[in_spec, in_spec],
            out_specs=pl.BlockSpec((1, 1, 1), lambda p, i: (p, 0, 0)),
            scratch_shapes=[pltpu.VMEM((acc_rows, lanes), jnp.float32)],
        ),
        compiler_params=pltpu.CompilerParams(
            dimension_semantics=("parallel", "arbitrary"),
            vmem_limit_bytes=_VMEM_LIMIT_BYTES,
        ),
    )(o2, t2)

    # Combine per-core partials and apply the 1/N scale outside the kernel.
    return jnp.sum(partial) / jnp.float32(n)


if __name__ == "__main__":
    key = jax.random.PRNGKey(0)
    k1, k2, k3, k4 = jax.random.split(key, 4)

    # Primary example (small NCHW-like shapes, matching the module's usage).
    outputs = jax.random.normal(k1, (2, 4, 16, 16), dtype=jnp.float32)
    targets = jax.random.normal(k2, (2, 4, 16, 16), dtype=jnp.float32)

    loss = jax.block_until_ready(jax.jit(center_loss)(outputs, targets))
    ref = jnp.sum((outputs - targets) ** 2) / outputs.shape[0]
    assert jnp.allclose(loss, ref, rtol=1e-4, atol=1e-4), (loss, ref)

    # Extra check exercising the multi-block + ragged-tail (masked) path with a
    # small forced block size.
    o_b = jax.random.normal(k3, (3, 5, 64, 64), dtype=jnp.float32)
    t_b = jax.random.normal(k4, (3, 5, 64, 64), dtype=jnp.float32)
    loss_b = jax.block_until_ready(center_loss(o_b, t_b, block_rows=32))
    ref_b = jnp.sum((o_b - t_b) ** 2) / o_b.shape[0]
    assert jnp.allclose(loss_b, ref_b, rtol=1e-4, atol=1e-4), (loss_b, ref_b)

    print("KERNEL_OK")
</pallas_src>

<mosaic_0001>
module attributes {stable_mosaic.version = 11 : i64} {
  func.func @kernel(%arg0: i32, %arg1: i32, %arg2: memref<4x512xf32, #tpu.memory_space<vmem>>, %arg3: memref<4x512xf32, #tpu.memory_space<vmem>>, %arg4: memref<1x1x1xf32, #tpu.memory_space<vmem>>, %arg5: memref<4x512xf32, #tpu.memory_space<vmem>>) attributes {dimension_semantics = [#tpu.dimension_semantics<parallel>, #tpu.dimension_semantics<arbitrary>], iteration_bounds = array<i64: 1, 1>, scalar_prefetch = 0 : i64, scratch_operands = 1 : i64, tpu.core_type = #tpu.core_type<tc>, window_params = [{transform_indices = @transform_0, window_bounds = array<i64: 4, 512>}, {transform_indices = @transform_1, window_bounds = array<i64: 4, 512>}, {transform_indices = @transform_2, window_bounds = array<i64: 1, 1, 1>}]} {
    %c0_i32 = arith.constant 0 : i32
    %0 = arith.cmpi eq, %arg1, %c0_i32 : i32
    %1 = arith.extui %0 : i1 to i32
    %c0_i32_0 = arith.constant 0 : i32
    %2 = arith.cmpi ne, %1, %c0_i32_0 : i32
    scf.if %2 {
      %cst = arith.constant 0.000000e+00 : f32
      %13 = vector.broadcast %cst : f32 to vector<4x512xf32>
      %c0_10 = arith.constant 0 : index
      %c0_11 = arith.constant 0 : index
      %14 = vector.load %arg5[%c0_10, %c0_11] : memref<4x512xf32, #tpu.memory_space<vmem>>, vector<4x512xf32>
      tpu.vector_store %arg5[%c0_10, %c0_11], %13 {strides = array<i32>} : memref<4x512xf32, #tpu.memory_space<vmem>>, vector<4x512xf32>,
    } else {
    }
    %c0 = arith.constant 0 : index
    %c0_1 = arith.constant 0 : index
    %3 = vector.load %arg2[%c0, %c0_1] : memref<4x512xf32, #tpu.memory_space<vmem>>, vector<4x512xf32>
    %c0_2 = arith.constant 0 : index
    %c0_3 = arith.constant 0 : index
    %4 = vector.load %arg3[%c0_2, %c0_3] : memref<4x512xf32, #tpu.memory_space<vmem>>, vector<4x512xf32>
    %5 = arith.subf %3, %4 : vector<4x512xf32>
    %6 = arith.mulf %5, %5 : vector<4x512xf32>
    %c0_4 = arith.constant 0 : index
    %c0_5 = arith.constant 0 : index
    %7 = vector.load %arg5[%c0_4, %c0_5] : memref<4x512xf32, #tpu.memory_space<vmem>>, vector<4x512xf32>
    %8 = arith.addf %7, %6 : vector<4x512xf32>
    %c0_6 = arith.constant 0 : index
    %c0_7 = arith.constant 0 : index
    %9 = vector.load %arg5[%c0_6, %c0_7] : memref<4x512xf32, #tpu.memory_space<vmem>>, vector<4x512xf32>
    tpu.vector_store %arg5[%c0_6, %c0_7], %8 {strides = array<i32>} : memref<4x512xf32, #tpu.memory_space<vmem>>, vector<4x512xf32>,
    %c0_i32_8 = arith.constant 0 : i32
    %10 = arith.cmpi eq, %arg1, %c0_i32_8 : i32
    %11 = arith.extui %10 : i1 to i32
    %c0_i32_9 = arith.constant 0 : i32
    %12 = arith.cmpi ne, %11, %c0_i32_9 : i32
    scf.if %12 {
      %c0_10 = arith.constant 0 : index
      %c0_11 = arith.constant 0 : index
      %13 = vector.load %arg5[%c0_10, %c0_11] : memref<4x512xf32, #tpu.memory_space<vmem>>, vector<4x512xf32>
      %cst = arith.constant dense<0.000000e+00> : vector<512xf32>
      %14 = vector.multi_reduction <add>, %13, %cst [0] : vector<4x512xf32> to vector<512xf32>
      %15 = vector.shape_cast %14 : vector<512xf32> to vector<1x512xf32>
      %cst_12 = arith.constant dense<0.000000e+00> : vector<1xf32>
      %16 = vector.multi_reduction <add>, %15, %cst_12 [1] : vector<1x512xf32> to vector<1xf32>
      %17 = vector.shape_cast %16 : vector<1xf32> to vector<1x1xf32>
      %18 = vector.shape_cast %17 : vector<1x1xf32> to vector<1x1x1xf32>
      %c0_13 = arith.constant 0 : index
      %c0_14 = arith.constant 0 : index
      %c0_15 = arith.constant 0 : index
      %19 = vector.load %arg4[%c0_13, %c0_14, %c0_15] : memref<1x1x1xf32, #tpu.memory_space<vmem>>, vector<1x1x1xf32>
      tpu.vector_store %arg4[%c0_13, %c0_14, %c0_15], %18 {strides = array<i32>} : memref<1x1x1xf32, #tpu.memory_space<vmem>>, vector<1x1x1xf32>,
    } else {
    }
    return
  }
  func.func @transform_0(%arg0: i32, %arg1: i32) -> (i32, i32) {
    %c1_i32 = arith.constant 1 : i32
    %0 = arith.muli %arg0, %c1_i32 : i32
    %1 = arith.addi %0, %arg1 : i32
    %c0_i32 = arith.constant 0 : i32
    %c0_i32_0 = arith.constant 0 : i32
    return %1, %c0_i32 : i32, i32
  }
  func.func @transform_1(%arg0: i32, %arg1: i32) -> (i32, i32) {
    %c1_i32 = arith.constant 1 : i32
    %0 = arith.muli %arg0, %c1_i32 : i32
    %1 = arith.addi %0, %arg1 : i32
    %c0_i32 = arith.constant 0 : i32
    %c0_i32_0 = arith.constant 0 : i32
    return %1, %c0_i32 : i32, i32
  }
  func.func @transform_2(%arg0: i32, %arg1: i32) -> (i32, i32, i32) {
    %c0_i32 = arith.constant 0 : i32
    %c0_i32_0 = arith.constant 0 : i32
    %c0_i32_1 = arith.constant 0 : i32
    return %arg0, %c0_i32, %c0_i32_0 : i32, i32, i32
  }
}

</mosaic_0001>

<bundles_post_ra>
// kernel: center_loss.1
= control target key start
LH: loop header
LB: loop body
LE: loop exit
PB: predicated region body
PF: predicated region fallthrough
CT: control target
= control target key end

     0   :  { %s199_s0 = inlined_call_operand.vmem [shape: f32[4,512], index: 0, kind: input, shape index: {}]   ;;  %s200_s1 = inlined_call_operand.vmem [shape: f32[4,512], index: 1, kind: input, shape index: {}]   ;;  %s201_s2 = inlined_call_operand.hbm [shape: f32[1,1,1], index: 2, kind: output, shape index: {}]  }
   0x1   :  { %v58_v0 = vld [vmem:[%s199_s0] sm:$0xff]  ;;  %v59_v1 = vld [vmem:[%s199_s0 + $0x8] sm:$0xff] }
   0x2   :  { %v60_v2 = vld [vmem:[%s200_s1] sm:$0xff]  ;;  %v61_v3 = vld [vmem:[%s200_s1 + $0x8] sm:$0xff] }
   0x3   :  { %v62_v4 = vsub.f32 %v58_v0, %v60_v2 }
   0x4   :  { %7 = vsyncpa [#allocation4], 0  ;;  %v63_v5 = vsub.f32 %v59_v1, %v61_v3  ;;  %vm83_vm0 = vcmask 1043456   ;;  %s168_s0 = smov [#allocation3]   ;;  %vm117_vm1 = vcmask 0  }
   0x5   :  { %v64_v6 = vmul.f32 %v62_v4, %v62_v4  ;;  %s125_s1 = sshll.u32 %s168_s0, 4  ;;  %s126_s1 = int_to_ptr.vmem [resolvable:$true] %s125_s1 }
   0x6   :  { %v65_v7 = vmul.f32 %v63_v5, %v63_v5  ;;  %s146_s17 = scalar_lea.vmem %s126_s1, 16  ;;  %s150_s18 = scalar_lea.vmem %s126_s1, 32 }
   0x7   :  { %v79_v8 = vcombine.high %v64_v6, %v64_v6  ;;  %v84_v9 = vsel %vm83_vm0, %v64_v6, 0.0  ;;  %p147_p0 = scmp.ne.s32.totalorder %s126_s1, %s146_s17  ;;  %p151_p1 = scmp.lt.s32.totalorder %s126_s1, %s126_s1 }
   0x8   :  { %v80_v10 = vcombine.high %v65_v7, %v65_v7  ;;  %v85_v11 = vrot.slane %v84_v9, 4  ;;  %v98_v12 = vsel %vm83_vm0, %v65_v7, 0.0  ;;  %p152_p2 = scmp.lt.s32.totalorder %s150_s18, %s146_s17 }
   0x9   :  { %v91_v13 = vsel %vm83_vm0, %v79_v8, 0.0  ;;  %v99_v14 = vrot.slane %v98_v12, 4 }
   0xa   :  { %v86_v15 = vadd.f32 %v85_v11, %v84_v9  ;;  %v92_v16 = vrot.slane %v91_v13, 4  ;;  %v105_v17 = vsel %vm83_vm0, %v80_v10, 0.0  ;;  %p153_p3 = por %p152_p2, %p151_p1 }
   0xb   :  { %v100_v18 = vadd.f32 %v99_v14, %v98_v12  ;;  %v106_v19 = vrot.slane %v105_v17, 4 }
   0xc   :  { %v87_v20 = vrot.slane %v86_v15, 2  ;;  %v93_v21 = vadd.f32 %v92_v16, %v91_v13  ;;  %p154_p4 = pnand %p153_p3, %p147_p0 }
   0xd   :  { %v101_v22 = vrot.slane %v100_v18, 2  ;;  %v107_v23 = vadd.f32 %v106_v19, %v105_v17 }
   0xe   :  { %v88_v24 = vadd.f32 %v87_v20, %v86_v15  ;;  %v94_v25 = vrot.slane %v93_v21, 2 }
   0xf   :  { %v102_v26 = vadd.f32 %v101_v22, %v100_v18  ;;  %v108_v27 = vrot.slane %v107_v23, 2 }
  0x10   :  { %v89_v28 = vrot.slane %v88_v24, 1  ;;  %v95_v29 = vadd.f32 %v94_v25, %v93_v21 }
  0x11   :  { %v103_v30 = vrot.slane %v102_v26, 1  ;;  %v109_v31 = vadd.f32 %v108_v27, %v107_v23 }
  0x12   :  { %v90_v32 = vadd.f32 %v89_v28, %v88_v24  ;;  %v96_v33 = vrot.slane %v95_v29, 1 }
  0x13   :  { %v110_v34 = vrot.slane %v109_v31, 1  ;;  %v104_v36 = vadd.f32 %v103_v30, %v102_v26 }
  0x14   :  { %v97_v35 = vadd.f32 %v96_v33, %v95_v29 }
  0x15   :  { %v111_v37 = vadd.f32 %v110_v34, %v109_v31 }
  0x16   :  { %v112_v38 = vadd.f32 %v97_v35, %v90_v32 }
  0x18   :  { %v113_v39 = vadd.f32 %v112_v38, %v104_v36 }
  0x1a   :  { %v114_v40 = vadd.f32 %v113_v39, %v111_v37 }
  0x1c   :  { %115 = vadd.xlane.f32.xlu0 %v114_v40 }
  0xa5   :  { %v116_v41 = vpop.xlane.xlu0 %115 }
  0xa6   :  { %118 = vst.msk [vmem:[#allocation3] sm:$0x1] %vm117_vm1, %v116_v41 }
  0xa7   :  { %157 = shalt.err (!%p154_p4)
}
  0xa8   :  { %128 = dma.vmem_to_hbm [thread:$0]  %s126_s1, 16, %s201_s2, [#allocation4]  }
  0xa9   :  { %166 = dma.done.wait [#allocation4], 16  }
  0xaa   :  { %167 = vsyncadd [#allocation4], 4294967280 }
  0xab   :  { %132 = vsyncpa [#allocation4], 1 }

</bundles_post_ra>
